<compile_context>
chip_gen: v6e
topology: v6e:2x2x1
jax: 0.10.0
libtpu: 0.0.40
codegen_flags: <defaults>
</compile_context>

<pallas_src>
import jax
import jax.numpy as jnp
from jax.experimental import pallas as pl
from jax.experimental.pallas import tpu as pltpu


def _round_up(x, m):
    return ((x + m - 1) // m) * m


def _round_down(x, m):
    return (x // m) * m


def _vmem_capacity_bytes():
    try:
        return int(pltpu.get_tpu_info().vmem_capacity_bytes)
    except Exception:
        return 128 << 20  # v5e/v6e default


def _spec(shape, index_map, *, single_buffer=False):
    """BlockSpec helper: single_buffer drops the 2nd pipeline buffer for blocks
    whose index never changes (resident weights / biases)."""
    if single_buffer:
        try:
            return pl.BlockSpec(shape, index_map, pipeline_mode=pl.Buffered(1))
        except TypeError:  # older jax without pipeline_mode kwarg
            pass
    return pl.BlockSpec(shape, index_map)


# ----------------------------- kernels --------------------------------------


def _ffn_kernel_resident(x_ref, w1_ref, b1_ref, w2_ref, b2_ref, o_ref):
    # x:(tm,dm)  w1:(dm,dff)  b1:(1,dff)  w2:(dff,dm)  b2:(1,dm)  o:(tm,dm)
    h = jnp.dot(x_ref[...], w1_ref[...], preferred_element_type=jnp.float32)
    h = jnp.maximum(h + b1_ref[...].astype(jnp.float32), 0.0)
    # dropout: identity (eval mode)
    y = jnp.dot(h.astype(w2_ref.dtype), w2_ref[...],
                preferred_element_type=jnp.float32)
    o_ref[...] = (y + b2_ref[...].astype(jnp.float32)).astype(o_ref.dtype)


def _ffn_kernel_stream(x_ref, w1_ref, b1_ref, w2_ref, b2_ref, o_ref, acc_ref):
    # d_ff is K-blocked: acc += relu(x @ W1_k + b1_k) @ W2_k  (exact, ReLU is
    # elementwise per d_ff column).  Fused epilogue on the last k step; this
    # kernel is only used with num_programs(1) >= 2.
    k = pl.program_id(1)
    nk = pl.num_programs(1)

    h = jnp.dot(x_ref[...], w1_ref[...], preferred_element_type=jnp.float32)
    h = jnp.maximum(h + b1_ref[...].astype(jnp.float32), 0.0)
    # dropout: identity (eval mode)
    part = jnp.dot(h.astype(w2_ref.dtype), w2_ref[...],
                   preferred_element_type=jnp.float32)

    @pl.when(k == 0)
    def _():
        acc_ref[...] = part

    @pl.when(jnp.logical_and(k > 0, k < nk - 1))
    def _():
        acc_ref[...] = acc_ref[...] + part

    @pl.when(k == nk - 1)
    def _():
        o_ref[...] = (acc_ref[...] + part
                      + b2_ref[...].astype(jnp.float32)).astype(o_ref.dtype)


# --------------------------- tile selection ----------------------------------


def _resident_bytes(tm, d_model, d_ff, xb, wb):
    w_bytes = ((d_model * d_ff + d_ff * d_model) * wb     # W1^T + W2^T, single buf
               + 8 * (d_ff + d_model) * wb)                # biases, 8-sublane padded
    per_tile = (
        4 * tm * d_model * xb        # x + out tiles, double buffered
        + tm * d_ff * 4              # ReLU intermediate (f32)
        + tm * d_ff * wb             # cast copy feeding the 2nd matmul
        + tm * d_model * 4           # 2nd-matmul f32 result
    )
    return w_bytes + per_tile


def _stream_bytes(tm, tk, d_model, xb, wb):
    return (
        4 * d_model * tk * wb        # W1^T + W2^T chunks, double buffered
        + 2 * 8 * tk * wb            # b1 chunk (8-sublane padded), double buffered
        + 8 * d_model * wb           # b2, single buffered
        + 4 * tm * d_model * xb      # x + out tiles, double buffered
        + tm * d_model * 4           # f32 accumulator scratch
        + tm * tk * 4                # ReLU intermediate (f32)
        + tm * tk * wb               # cast copy feeding the 2nd matmul
        + tm * d_model * 4           # partial 2nd-matmul result
    )


def _pick_resident(d_model, d_ff, xb, wb, budget, row_align, tm_cap):
    tm = max(row_align, _round_down(min(512, tm_cap), row_align))
    while tm > row_align and _resident_bytes(tm, d_model, d_ff, xb, wb) > budget:
        tm -= row_align
    est = _resident_bytes(tm, d_model, d_ff, xb, wb)
    return tm, est <= budget, est


def _pick_stream(d_model, d_ff, xb, wb, budget, row_align, tm_cap, tm_target):
    # tk must be a multiple of 128 that divides d_ff (lane constraint and no
    # ragged / garbage K blocks).
    tk_cands = [t for t in range(min(_round_down(d_ff, 128), 1024), 127, -128)
                if d_ff % t == 0]
    if not tk_cands:
        return None  # cannot K-block cleanly; caller falls back to resident
    tm_hi = max(row_align, _round_down(min(tm_target, tm_cap), row_align))
    for tm in range(tm_hi, row_align - 1, -row_align):
        for tk in tk_cands:
            est = _stream_bytes(tm, tk, d_model, xb, wb)
            if est <= budget:
                return tm, tk, est
    tm, tk = row_align, tk_cands[-1]
    return tm, tk, _stream_bytes(tm, tk, d_model, xb, wb)


# ------------------------------ wrapper --------------------------------------


def positionwise_ffn(x, w1_t, b1, w2_t, b2):
    """Fused FFN: y = relu(x @ w1_t + b1) @ w2_t + b2   (dropout = identity).

    x:    (B, S, d_model)
    w1_t: (d_model, d_ff)   -- nn.Linear w_1.weight transposed ONCE at init
    b1:   (d_ff,)
    w2_t: (d_ff, d_model)   -- nn.Linear w_2.weight transposed ONCE at init
    b2:   (d_model,)

    For v5e (no fast f32 MXU path) and for best v6e/v7x throughput, cast the
    weights to bf16 once at init; accumulation is always f32.
    """
    B, S, d_model = x.shape
    d_ff = w1_t.shape[1]
    assert w1_t.shape == (d_model, d_ff)
    assert w2_t.shape == (d_ff, d_model)
    assert b1.shape == (d_ff,) and b2.shape == (d_model,)

    rows = B * S
    xb = x.dtype.itemsize
    wb = w1_t.dtype.itemsize

    # Sub-32-bit dtypes pack rows along sublanes: align tm accordingly.
    row_align = {4: 8, 2: 16, 1: 32}.get(xb, 8)
    rows_aligned = _round_up(rows, row_align)

    # --- generation-aware VMEM budget (128 MiB v5e/v6e, 64 MiB v7x) ----------
    vmem_cap = _vmem_capacity_bytes()
    budget = max(16 << 20, min(vmem_cap - (12 << 20), 100 << 20))

    # --- row-tile cap: keep >= 2 row tiles when possible (v7x has 2 TCs) -----
    tm_cap = rows_aligned
    if rows_aligned >= 2 * row_align:
        tm_cap = min(tm_cap, _round_up((rows_aligned + 1) // 2, row_align))

    # --- choose execution scheme ---------------------------------------------
    tm, res_fits, res_est = _pick_resident(d_model, d_ff, xb, wb, budget,
                                           row_align, tm_cap)
    if res_fits:
        resident, tk, n_k, vmem_est = True, d_ff, 1, res_est
    else:
        tm_target = 768 if vmem_cap > (80 << 20) else 640
        picked = _pick_stream(d_model, d_ff, xb, wb, budget, row_align,
                              tm_cap, tm_target)
        if picked is None:
            # d_ff not 128-divisible: run resident anyway (best effort).
            resident, tk, n_k, vmem_est = True, d_ff, 1, res_est
        else:
            tm, tk, vmem_est = picked
            n_k = d_ff // tk
            resident = (n_k == 1)   # stream kernel requires >= 2 k steps

    vmem_limit = int(min(vmem_cap - (4 << 20),
                         max(32 << 20, vmem_est + (8 << 20))))
    vmem_limit = max(vmem_limit, 16 << 20)

    rows_pad = _round_up(rows, tm)
    n_row_tiles = rows_pad // tm

    x2 = x.reshape(rows, d_model)
    if rows_pad != rows:
        x2 = jnp.pad(x2, ((0, rows_pad - rows), (0, 0)))
    b1_2 = b1.reshape(1, d_ff)
    b2_2 = b2.reshape(1, d_model)

    # --- advisory cost estimate, consistent with the chosen structure --------
    flops = 4 * rows_pad * d_model * d_ff
    weight_passes = 1 if resident else n_row_tiles
    bytes_accessed = (
        rows_pad * d_model * xb * 2
        + weight_passes * (d_model * d_ff + d_ff * d_model + d_ff) * wb
        + d_model * wb
    )
    cost = pl.CostEstimate(flops=int(flops), transcendentals=0,
                           bytes_accessed=int(bytes_accessed))

    if resident:
        grid_spec = pltpu.PrefetchScalarGridSpec(
            num_scalar_prefetch=0,
            grid=(n_row_tiles,),
            in_specs=[
                pl.BlockSpec((tm, d_model), lambda i: (i, 0)),                    # x
                _spec((d_model, d_ff), lambda i: (0, 0), single_buffer=True),     # W1^T
                _spec((1, d_ff),       lambda i: (0, 0), single_buffer=True),     # b1
                _spec((d_ff, d_model), lambda i: (0, 0), single_buffer=True),     # W2^T
                _spec((1, d_model),    lambda i: (0, 0), single_buffer=True),     # b2
            ],
            out_specs=pl.BlockSpec((tm, d_model), lambda i: (i, 0)),
        )
        kernel = _ffn_kernel_resident
        dims = ("parallel",)
    else:
        grid_spec = pltpu.PrefetchScalarGridSpec(
            num_scalar_prefetch=0,
            grid=(n_row_tiles, n_k),
            in_specs=[
                pl.BlockSpec((tm, d_model), lambda i, k: (i, 0)),                 # x
                pl.BlockSpec((d_model, tk), lambda i, k: (0, k)),                 # W1^T chunk
                pl.BlockSpec((1, tk),       lambda i, k: (0, k)),                 # b1 chunk
                pl.BlockSpec((tk, d_model), lambda i, k: (k, 0)),                 # W2^T chunk
                _spec((1, d_model), lambda i, k: (0, 0), single_buffer=True),     # b2
            ],
            out_specs=pl.BlockSpec((tm, d_model), lambda i, k: (i, 0)),
            scratch_shapes=[pltpu.VMEM((tm, d_model), jnp.float32)],
        )
        kernel = _ffn_kernel_stream
        dims = ("parallel", "arbitrary")

    out = pl.pallas_call(
        kernel,
        out_shape=jax.ShapeDtypeStruct((rows_pad, d_model), x.dtype),
        grid_spec=grid_spec,
        compiler_params=pltpu.CompilerParams(
            dimension_semantics=dims,
            vmem_limit_bytes=vmem_limit,
        ),
        cost_estimate=cost,
    )(x2, w1_t, b1_2, w2_t, b2_2)

    return out[:rows].reshape(B, S, d_model)


if __name__ == "__main__":
    # Small shapes consistent with the module: batch=2, seq=8, d_model=32, d_ff=64
    B, S, d_model, d_ff = 2, 8, 32, 64

    key = jax.random.PRNGKey(0)
    kx, k1, k2, k3, k4 = jax.random.split(key, 5)

    x = jax.random.normal(kx, (B, S, d_model), dtype=jnp.float32)

    # PyTorch Linear parameter shapes: weight (out, in), bias (out,)
    w1 = jax.random.normal(k1, (d_ff, d_model), dtype=jnp.float32) * 0.1
    b1 = jax.random.normal(k2, (d_ff,), dtype=jnp.float32) * 0.1
    w2 = jax.random.normal(k3, (d_model, d_ff), dtype=jnp.float32) * 0.1
    b2 = jax.random.normal(k4, (d_model,), dtype=jnp.float32) * 0.1

    # Transpose ONCE (at param-init time), never per call.
    w1_t = jnp.transpose(w1)   # (d_model, d_ff)
    w2_t = jnp.transpose(w2)   # (d_ff, d_model)

    y = positionwise_ffn(x, w1_t, b1, w2_t, b2)
    jax.block_until_ready(y)

    # Pure-JAX reference (eval-mode dropout == identity).  Tolerance allows
    # for the TPU MXU running f32 matmuls via bf16 passes at default precision.
    h_ref = jnp.maximum(x @ w1.T + b1, 0.0)
    y_ref = h_ref @ w2.T + b2
    assert y.shape == y_ref.shape
    assert jnp.allclose(y, y_ref, atol=2e-2, rtol=2e-2), "mismatch vs reference"

    print("KERNEL_OK")
</pallas_src>

<mosaic_0001>
module attributes {stable_mosaic.version = 11 : i64} {
  func.func @_ffn_kernel_resident(%arg0: i32, %arg1: memref<8x32xf32, #tpu.memory_space<vmem>>, %arg2: memref<32x64xf32, #tpu.memory_space<vmem>>, %arg3: memref<1x64xf32, #tpu.memory_space<vmem>>, %arg4: memref<64x32xf32, #tpu.memory_space<vmem>>, %arg5: memref<1x32xf32, #tpu.memory_space<vmem>>, %arg6: memref<8x32xf32, #tpu.memory_space<vmem>>) attributes {dimension_semantics = [#tpu.dimension_semantics<parallel>], iteration_bounds = array<i64: 2>, scalar_prefetch = 0 : i64, scratch_operands = 0 : i64, tpu.core_type = #tpu.core_type<tc>, window_params = [{transform_indices = @transform_0, window_bounds = array<i64: 8, 32>}, {pipeline_mode = #tpu.pipeline_mode<synchronous>, transform_indices = @transform_1, window_bounds = array<i64: 32, 64>}, {pipeline_mode = #tpu.pipeline_mode<synchronous>, transform_indices = @transform_2, window_bounds = array<i64: 1, 64>}, {pipeline_mode = #tpu.pipeline_mode<synchronous>, transform_indices = @transform_3, window_bounds = array<i64: 64, 32>}, {pipeline_mode = #tpu.pipeline_mode<synchronous>, transform_indices = @transform_4, window_bounds = array<i64: 1, 32>}, {transform_indices = @transform_5, window_bounds = array<i64: 8, 32>}]} {
    %c0 = arith.constant 0 : index
    %c0_0 = arith.constant 0 : index
    %0 = vector.load %arg1[%c0, %c0_0] : memref<8x32xf32, #tpu.memory_space<vmem>>, vector<8x32xf32>
    %c0_1 = arith.constant 0 : index
    %c0_2 = arith.constant 0 : index
    %1 = vector.load %arg2[%c0_1, %c0_2] : memref<32x64xf32, #tpu.memory_space<vmem>>, vector<32x64xf32>
    %cst = arith.constant dense<0.000000e+00> : vector<8x64xf32>
    %2 = tpu.matmul %0, %1, %cst {dimension_numbers = #tpu.dot_dimension_numbers<[1], [0], [0], [1], [0, 0, 1, 1], [], []>} : vector<8x32xf32>, vector<32x64xf32>, vector<8x64xf32> -> vector<8x64xf32>
    %c0_3 = arith.constant 0 : index
    %c0_4 = arith.constant 0 : index
    %3 = vector.load %arg3[%c0_3, %c0_4] : memref<1x64xf32, #tpu.memory_space<vmem>>, vector<1x64xf32>
    %4 = vector.broadcast %3 : vector<1x64xf32> to vector<8x64xf32>
    %5 = arith.addf %2, %4 : vector<8x64xf32>
    %cst_5 = arith.constant 0.000000e+00 : f32
    %6 = vector.broadcast %cst_5 : f32 to vector<8x64xf32>
    %7 = arith.maximumf %5, %6 : vector<8x64xf32>
    %c0_6 = arith.constant 0 : index
    %c0_7 = arith.constant 0 : index
    %8 = vector.load %arg4[%c0_6, %c0_7] : memref<64x32xf32, #tpu.memory_space<vmem>>, vector<64x32xf32>
    %cst_8 = arith.constant dense<0.000000e+00> : vector<8x32xf32>
    %9 = tpu.matmul %7, %8, %cst_8 {dimension_numbers = #tpu.dot_dimension_numbers<[1], [0], [0], [1], [0, 0, 1, 1], [], []>} : vector<8x64xf32>, vector<64x32xf32>, vector<8x32xf32> -> vector<8x32xf32>
    %c0_9 = arith.constant 0 : index
    %c0_10 = arith.constant 0 : index
    %10 = vector.load %arg5[%c0_9, %c0_10] : memref<1x32xf32, #tpu.memory_space<vmem>>, vector<1x32xf32>
    %11 = vector.broadcast %10 : vector<1x32xf32> to vector<8x32xf32>
    %12 = arith.addf %9, %11 : vector<8x32xf32>
    %c0_11 = arith.constant 0 : index
    %c0_12 = arith.constant 0 : index
    %13 = vector.load %arg6[%c0_11, %c0_12] : memref<8x32xf32, #tpu.memory_space<vmem>>, vector<8x32xf32>
    tpu.vector_store %arg6[%c0_11, %c0_12], %12 {strides = array<i32>} : memref<8x32xf32, #tpu.memory_space<vmem>>, vector<8x32xf32>,
    return
  }
  func.func @transform_0(%arg0: i32) -> (i32, i32) {
    %c0_i32 = arith.constant 0 : i32
    %c0_i32_0 = arith.constant 0 : i32
    return %arg0, %c0_i32 : i32, i32
  }
  func.func @transform_1(%arg0: i32) -> (i32, i32) {
    %c0_i32 = arith.constant 0 : i32
    %c0_i32_0 = arith.constant 0 : i32
    %c0_i32_1 = arith.constant 0 : i32
    return %c0_i32, %c0_i32_0 : i32, i32
  }
  func.func @transform_2(%arg0: i32) -> (i32, i32) {
    %c0_i32 = arith.constant 0 : i32
    %c0_i32_0 = arith.constant 0 : i32
    %c0_i32_1 = arith.constant 0 : i32
    return %c0_i32, %c0_i32_0 : i32, i32
  }
  func.func @transform_3(%arg0: i32) -> (i32, i32) {
    %c0_i32 = arith.constant 0 : i32
    %c0_i32_0 = arith.constant 0 : i32
    %c0_i32_1 = arith.constant 0 : i32
    return %c0_i32, %c0_i32_0 : i32, i32
  }
  func.func @transform_4(%arg0: i32) -> (i32, i32) {
    %c0_i32 = arith.constant 0 : i32
    %c0_i32_0 = arith.constant 0 : i32
    %c0_i32_1 = arith.constant 0 : i32
    return %c0_i32, %c0_i32_0 : i32, i32
  }
  func.func @transform_5(%arg0: i32) -> (i32, i32) {
    %c0_i32 = arith.constant 0 : i32
    %c0_i32_0 = arith.constant 0 : i32
    return %arg0, %c0_i32 : i32, i32
  }
}

</mosaic_0001>

<bundles_post_ra>
// kernel: tpu_custom_call.1
= control target key start
LH: loop header
LB: loop body
LE: loop exit
PB: predicated region body
PF: predicated region fallthrough
CT: control target
= control target key end

     0   :  { %10 = vsyncpa [#allocation3], 0  ;;  %s803_s0 = inlined_call_operand.vmem [shape: f32[16,32], index: 0, kind: input, shape index: {}]   ;;  %s804_s1 = inlined_call_operand.vmem [shape: f32[32,64], index: 1, kind: input, shape index: {}]   ;;  %s805_s2 = inlined_call_operand.vmem [shape: f32[1,64], index: 2, kind: input, shape index: {}]   ;;  %s806_s3 = inlined_call_operand.vmem [shape: f32[64,32], index: 3, kind: input, shape index: {}]   ;;  %s807_s4 = inlined_call_operand.vmem [shape: f32[1,32], index: 4, kind: input, shape index: {}]   ;;  %s808_s5 = inlined_call_operand.hbm [shape: f32[16,32], index: 5, kind: output, shape index: {}]  }
   0x1   :  { %12 = vsyncpa [#allocation3 + $0x1], 0  ;;  %s664_s18 = smov 0   ;;  %s666_s19 = smov 0  }
   0x2   :  { %s668_s20 = smov 0   ;;  %s670_s21 = smov 0  }
   0x3 LB: > { %s685_s22 = sadd.s32 4294967295, %s629_s21   ;;  %s470_s23 = sadd.s32 4294967294, %s629_s21   ;;  %s629_s21 = sphi %s670_s21, %s814_s21   ;;  %s625_s20 = sphi %s668_s20, %s813_s20   ;;  %s621_s19 = sphi %s666_s19, %s812_s19   ;;  %s617_s18 = sphi %s664_s18, %s811_s18  }
   0x4   : > { %s689_s24 = sadd.s32 1, %s629_s21   ;;  %s135_s25 = sadd.s32 1, %s625_s20 }
   0x5   : > { %s132_s26 = ssub.s32 %s629_s21, %s689_s24  ;;  %p145_p0 = scmp.ne.s32.totalorder %s625_s20, %s621_s19 }
   0x6   : > { %p133_p1 = scmp.eq.s32.totalorder %s132_s26, 0  ;;  %p146_p2 = scmp.eq.s32.totalorder %s685_s22, 1 }
   0x7   : > { %p151_p3 = scmp.ne.s32.totalorder %s621_s19, %s617_s18  ;;  %p152_p4 = scmp.eq.s32.totalorder %s470_s23, 1 }
   0x8   : > { %s700_s27 = scalar_select %p133_p1, %s625_s20, %s135_s25  }
   0x9   : > { %p702_p5 = por %p146_p2, %p145_p0  ;;  %p706_p6 = por %p152_p4, %p151_p3 }
   0xa   : > { %p473_p7 = scmp.ge.s32.totalorder %s629_s21, 1  ;;  %p189_p8 = scmp.lt.s32.totalorder %s629_s21, 3 }
   0xc   : > { %p190_p9 = pnand %p473_p7, %p189_p8 }
   0xd   : > { %p216_p10 = scmp.lt.s32.totalorder (!%p190_p9), %s685_s22, 1  ;;  %s213_s26 = sand.u32 (!%p190_p9), 1, %s621_s19  }
   0xe   : > { %193 = sbr.rel (%p190_p9) target bundleno = 433 (0x1b1), region = 40  ;;  %s474_s30 = sshll.u32 (!%p190_p9), %s213_s26, 3 }
   0xf   : > { %s481_s8 = sshll.u32 (!%p190_p9), %s685_s22, 7  ;;  %s215_s9 = scalar_lea.vmem (!%p190_p9), [#allocation2], %s474_s30 }
  0x10   : > { %s411_s10 = sshll.u32 (!%p190_p9), %s215_s9, 4  ;;  %s767_s13 = scalar_lea.hbm (!%p190_p9), %s808_s5, %s481_s8  ;;  %s412_s10 = int_to_ptr.vmem [resolvable:$true] %s411_s10 }
  0x11   : > { %s398_s14 = scalar_lea.sflag (!%p190_p9), [#allocation3], %s213_s26  ;;  %s569_s15 = scalar_lea.vmem (!%p190_p9), %s412_s10, 128 }
  0x12   : > { %p570_p11 = scmp.ne.s32.totalorder (!%p190_p9), %s412_s10, %s569_s15 }
  0x13   : > { %v224_v0 = vld [vmem:[%s804_s1 + $0x18] sm:$0xff]  ;;  %v631_v1 = vmov 0.0   ;;  %v223_v2 = vld [vmem:[%s804_s1 + $0x10] sm:$0xff]  ;;  %vm632_vm0 = vmmov 0   ;;  %s217_s11 = scalar_select %p216_p10, %s685_s22, 1  ;;  %v222_v5 = vld [vmem:[%s804_s1 + $0x8] sm:$0xff] }
  0x14   : > { %498 = vmatprep.subr.mxu0 %v631_v1  ;;  %506 = vmatprep.mubr.msk.f32.mxu0 %vm632_vm0, %v631_v1  ;;  %v314_v3 = vld [vmem:[%s806_s3 + $0x38] sm:$0xff]  ;;  %v313_v4 = vld [vmem:[%s806_s3 + $0x30] sm:$0xff]  ;;  %v312_v6 = vld [vmem:[%s806_s3 + $0x28] sm:$0xff]  ;;  %vm232_vm1 = vcmask 261120   ;;  %vm322_vm2 = vcmask 523264   ;;  %p571_p12 = pnand %p570_p11, %p702_p5  ;;  %s633_s22 = smov [#allocation2]  }
  0x15   : > { %499 = vmatpush3.msra.mxu0 %v224_v0  ;;  %509 = vmatprep.subr.mxu1 %v631_v1  ;;  %s475_s16 = sshll.u32 %s217_s11, 3  ;;  %v221_v7 = vld [vmem:[%s804_s1] sm:$0xff]  ;;  %v310_v10 = vld [vmem:[%s806_s3 + $0x18] sm:$0xff]  ;;  %v309_v11 = vld [vmem:[%s806_s3 + $0x10] sm:$0xff] }
  0x16   : > { %500 = vmatprep.subr.mxu0 %v631_v1  ;;  %510 = vmatpush3.msra.mxu1 %v314_v3  ;;  %s219_s7 = scalar_lea.vmem %s803_s0, %s475_s16  ;;  %v311_v9 = vld [vmem:[%s806_s3 + $0x20] sm:$0xff]  ;;  %v308_v12 = vld [vmem:[%s806_s3 + $0x8] sm:$0xff]  ;;  %p572_p13 = pneg %p571_p12 }
  0x17   : > { %501 = vmatpush3.msra.mxu0 %v223_v2  ;;  %511 = vmatprep.subr.mxu1 %v631_v1  ;;  %v220_v8 = vld [vmem:[%s219_s7] sm:$0xff]  ;;  %s573_s16 = sshll.u32 %s633_s22, 4  ;;  %s574_s16 = int_to_ptr.vmem [resolvable:$false] %s573_s16 }
  0x18   : > { %502 = vmatprep.subr.mxu0 %v631_v1  ;;  %512 = vmatpush3.msra.mxu1 %v313_v4  ;;  %v307_v13 = vld [vmem:[%s806_s3] sm:$0xff]  ;;  %s575_s17 = scalar_lea.vmem %s574_s16, 256  ;;  %p576_p0 = scmp.lt.s32.totalorder %s412_s10, %s574_s16 }
  0x19   : > { %503 = vmatpush3.msra.mxu0 %v222_v5  ;;  %513 = vmatprep.subr.mxu1 %v631_v1  ;;  %v476_v14 = vld [vmem:[%s805_s2] ss:$0 sm:$0xff]  ;;  %p577_p1 = scmp.lt.s32.totalorder %s575_s17, %s569_s15 }
  0x1a   : > { %504 = vmatprep.subr.mxu0 %v631_v1  ;;  %514 = vmatpush3.msra.mxu1 %v312_v6  ;;  %v478_v19 = vld [vmem:[%s807_s4] ss:$0 sm:$0xff] }
  0x1b   : > { %505 = vmatpush3.msra.mxu0 %v221_v7  ;;  %515 = vmatprep.subr.mxu1 %v631_v1  ;;  %p578_p2 = por %p577_p1, %p576_p0 }
  0x1c   : > { %507 = vmatmul.mubr.msk.f32.vlgmr.msra.gmra.mxu0 %vm232_vm1, %v220_v8  ;;  %516 = vmatpush3.msra.mxu1 %v311_v9 }
  0x1d   : > { %517 = vmatprep.subr.mxu1 %v631_v1  ;;  %525 = vmatprep.mubr.msk.f32.mxu1 %vm632_vm0, %v631_v1  ;;  %p579_p3 = pnand %p578_p2, %p572_p13 }
  0x1e   : > { %518 = vmatpush3.msra.mxu1 %v310_v10 }
  0x1f   : > { %519 = vmatprep.subr.mxu1 %v631_v1 }
  0x20   : > { %520 = vmatpush3.msra.mxu1 %v309_v11 }
  0x21   : > { %521 = vmatprep.subr.mxu1 %v631_v1 }
  0x22   : > { %522 = vmatpush3.msra.mxu1 %v308_v12 }
  0x23   : > { %523 = vmatprep.subr.mxu1 %v631_v1 }
  0x24   : > { %524 = vmatpush3.msra.mxu1 %v307_v13 }
  0xdc   : > { %v302_v15 = vpop.f32.mrf.mxu0 }
  0xdd   : > { %v303_v16 = vadd.f32 %v476_v14, %v302_v15 }
  0xde   : > { %v508_v17 = vpop.f32.mrf.mxu0 }
  0xdf   : > { %v306_v18 = vmax.f32 %v303_v16, 0.0 }
  0xe1   : > { %526 = vmatmul.mubr.msk.f32.vlgmr.msra.gmra.mxu1 %vm322_vm2, %v306_v18 }
 0x1a1   : > { %v392_v20 = vpop.f32.mrf.mxu1 }
 0x1a2   : > { %v393_v21 = vadd.f32 %v478_v19, %v392_v20 }
 0x1a3   : > { %v527_v22 = vpop.f32.mrf.mxu1 }
 0x1a4   : > { %396 = vst.msk [vmem:[%s215_s9] sm:$0xff] %vm232_vm1, %v393_v21 }
 0x1a5   : > { %582 = shalt.err (!%p579_p3)
}
 0x1a6   : > { %s583_s23 = scalar_lea.hbm %s767_s13, 128  ;;  %s587_s30 = scalar_lea.hbm %s808_s5, 256 }
 0x1a7   : > { %p584_p4 = scmp.ne.s32.totalorder %s767_s13, %s583_s23  ;;  %p588_p9 = scmp.lt.s32.totalorder %s767_s13, %s808_s5 }
 0x1a8   : > { %p589_p10 = scmp.lt.s32.totalorder %s587_s30, %s583_s23 }
 0x1a9   : > { %p585_p7 = pnand %p584_p4, %p702_p5 }
 0x1aa   : > { %p590_p11 = por %p589_p10, %p588_p9 }
 0x1ab   : > { %p586_p8 = pneg %p585_p7 }
 0x1ad   : > { %p591_p12 = pnand %p590_p11, %p586_p8 }
 0x1af   : > { %594 = shalt.err (!%p591_p12)
}
 0x1b0   : > { %528 = dma.vmem_to_hbm [thread:$0]  (%p702_p5), %s412_s10, 128, %s767_s13, %s398_s14  }
 0x1b1 PF: > { %p534_p13 = scmp.ge.s32.totalorder %s629_s21, 2  ;;  %s423_s8 = sand.u32 1, %s617_s18  }
 0x1b2   : > { %s424_s9 = scalar_lea.sflag [#allocation3], %s423_s8 }
 0x1b3   : > { %p531_p0 = pnand %p534_p13, %p706_p6 }
 0x1b5   : > { %p532_p1 = pneg %p531_p0 }
 0x1b7   : > { %612 = dma.done.wait (%p532_p1), %s424_s9, 128  }
 0x1b8   : > { %614 = vsyncadd (%p532_p1), %s424_s9, 4294967168  ;;  %p15_p2 = scmp.ge.s32.totalorder %s689_s24, 4   ;;  %s811_s18 = smov %s621_s19 }
 0x1b9   : > { %s812_s19 = smov %s625_s20  ;;  %s813_s20 = smov %s700_s27 }
 0x1ba   : > { %s814_s21 = smov %s689_s24  ;;  %17 = sbr.rel (!%p15_p2) target bundleno = 3 (0x3), region = 75 }
 0x1bf   :  { %429 = vsyncpa [#allocation3], 1 }
 0x1c0   :  { %431 = vsyncpa [#allocation3 + $0x1], 1 }

</bundles_post_ra>
